<compile_context>
chip_gen: v6e
topology: v6e:2x2x1
jax: 0.10.0
libtpu: 0.0.40
codegen_flags: <defaults>
</compile_context>

<pallas_src>
import functools
import math

import jax
import jax.numpy as jnp
from jax import lax
from jax.experimental import pallas as pl
from jax.experimental.pallas import tpu as pltpu


# ----------------------------------------------------------------------------
# Pallas kernel: fused channel projection for one (batch, L-tile) block.
#   x/mix/ref : (TL, C)    input dtype (f32), L on sublanes
#   w*        : (Cout, C)  VMEM-resident weight slices
#   pb        : (Cout, 1)  f32 per-batch bias (timestep proj + conv bias)
#   o         : (Cout, TL) out dtype (bf16), lane-dense stores
# ----------------------------------------------------------------------------
def _tsr_proj_kernel(x_ref, mix_ref, ref_ref, wx_ref, wm_ref, wr_ref, pb_ref,
                     o_ref):
    nt = (((1,), (1,)), ((), ()))   # contract both minor (channel) axes
    acc = lax.dot_general(wx_ref[...], x_ref[...], nt,
                          preferred_element_type=jnp.float32)
    acc = acc + lax.dot_general(wm_ref[...], mix_ref[...], nt,
                                preferred_element_type=jnp.float32)
    acc = acc + lax.dot_general(wr_ref[...], ref_ref[...], nt,
                                preferred_element_type=jnp.float32)
    o_ref[...] = (acc + pb_ref[...]).astype(o_ref.dtype)
    # TODO(synk): real UDiT applies x_mask inside the transformer stack; the
    # projection itself does not mask, so frames beyond x_len carry bias values.


# ----------------------------------------------------------------------------
# Plain-JAX glue
# ----------------------------------------------------------------------------
def create_mask(x, lengths):
    """x: (B, L, C), lengths: (B,) -> bool mask (B, L)."""
    _, L, _ = x.shape
    return (jnp.arange(L, dtype=jnp.int32)[None, :]
            < lengths.astype(jnp.int32)[:, None])


def _timestep_embedding(timesteps, dim):
    """Sinusoidal timestep embedding.
    TODO(synk): verify [cos, sin] ordering / frequency spacing vs real UDiT."""
    half = dim // 2
    freqs = jnp.exp(-math.log(10000.0)
                    * jnp.arange(half, dtype=jnp.float32) / half)
    args = timesteps.astype(jnp.float32)[:, None] * freqs[None, :]
    return jnp.concatenate([jnp.cos(args), jnp.sin(args)], axis=-1)  # (B, dim)


def _round_up(a, m):
    return (a + m - 1) // m * m


def _choose_l_tile(B, L, per_col_bytes, vmem_budget, max_tile):
    """L tile: full L when small, else the largest 128-multiple fitting the
    double-buffered VMEM budget; split L when B==1 so both v7x TCs get work."""
    if L <= 512:
        return L
    tl = min(max_tile, max(128, (vmem_budget // per_col_bytes) // 128 * 128))
    if tl >= L:
        tl = L
    if B * pl.cdiv(L, tl) < 2:
        tl = _round_up(pl.cdiv(L, 2), 128)
    return tl


# ----------------------------------------------------------------------------
# Forward wrapper
# ----------------------------------------------------------------------------
def solospeech_tsr_forward(params, x, timesteps, mixture, reference, x_len,
                           out_dtype=jnp.bfloat16, channels_last=True,
                           vmem_budget_bytes=24 << 20, max_l_tile=32768):
    """Returns (out, x_mask).  out is (B, L, Cout) if channels_last else
    (B, Cout, L) (NCL, matching what the real UDiT consumes)."""
    B, L, C = x.shape
    w = params["w"]                              # (Cout, 3C) k=1 conv weight
    Cout, threeC = w.shape
    assert threeC == 3 * C
    E = params["w_t"].shape[0]

    x_mask = create_mask(x, x_len)

    # Hoisted timestep path (tiny M=1 matmul): per-batch additive f32 bias.
    temb = _timestep_embedding(timesteps, E)                         # (B, E)
    per_batch_bias = (temb @ params["w_t"] + params["bias"]).astype(jnp.float32)
    per_batch_bias = per_batch_bias.reshape(B, Cout, 1)

    # Static per-input weight slices (replaces the activation concat).
    wx, wm, wr = w[:, :C], w[:, C:2 * C], w[:, 2 * C:]

    in_item = jnp.dtype(x.dtype).itemsize
    out_item = jnp.dtype(out_dtype).itemsize
    out_sub = 16 if out_item == 2 else 8
    # Double-buffered VMEM bytes per L column (narrow C tiles pad to 128 lanes,
    # (Cout, TL) output tile pads to a full sublane tile).
    per_col = (2 * 3 * _round_up(C, 128) * in_item
               + 2 * _round_up(Cout, out_sub) * out_item)

    TL = _choose_l_tile(B, L, per_col, vmem_budget_bytes, max_l_tile)
    n_l = pl.cdiv(L, TL)

    # What the kernel actually streams (inputs f32, output bf16, tiny weights).
    flops = 2 * B * L * threeC * Cout
    bytes_accessed = (3 * B * L * C * in_item
                      + 3 * Cout * C * jnp.dtype(w.dtype).itemsize
                      + B * Cout * 4
                      + B * Cout * L * out_item)
    cost = pl.CostEstimate(flops=flops, transcendentals=0,
                           bytes_accessed=int(bytes_accessed))

    # VMEM: double-buffered activation/output tiles + resident weights/bias.
    vmem_est = (per_col * TL
                + 2 * 3 * _round_up(Cout, 8) * _round_up(C, 128) * 4
                + 2 * _round_up(Cout, 8) * 128 * 4)
    try:
        vmem_cap = pltpu.get_tpu_info().vmem_capacity_bytes
    except Exception:
        vmem_cap = 64 << 20            # smallest per-TC VMEM (v7x)
    vmem_limit = int(min(vmem_cap // 2, max(vmem_est + (4 << 20), 8 << 20)))

    act_spec = lambda: pl.BlockSpec((None, TL, C), lambda b, l: (b, l, 0))
    w_spec = lambda: pl.BlockSpec((Cout, C), lambda b, l: (0, 0))

    out_ncl = pl.pallas_call(
        _tsr_proj_kernel,
        out_shape=jax.ShapeDtypeStruct((B, Cout, L), out_dtype),
        grid=(B, n_l),
        in_specs=[
            act_spec(), act_spec(), act_spec(),      # x, mixture, reference
            w_spec(), w_spec(), w_spec(),            # wx, wm, wr (resident)
            pl.BlockSpec((None, Cout, 1), lambda b, l: (b, 0, 0)),  # bias
        ],
        out_specs=pl.BlockSpec((None, Cout, TL), lambda b, l: (b, 0, l)),
        compiler_params=pltpu.CompilerParams(
            dimension_semantics=("parallel", "parallel"),
            vmem_limit_bytes=vmem_limit),
        cost_estimate=cost,
    )(x, mixture, reference, wx, wm, wr, per_batch_bias)

    if channels_last:
        # Matches the module's trailing transpose(1, 2); done in bf16 so it is
        # half the traffic of the previous f32 pass.  Pass channels_last=False
        # to feed an NCL consumer (the real UDiT) and skip it entirely.
        return jnp.transpose(out_ncl, (0, 2, 1)), x_mask
    return out_ncl, x_mask


def init_params(key, c_in, c_out, emb_dim):
    """Deterministic synthetic parameter init (shapes implied by the module)."""
    k1, k2 = jax.random.split(key, 2)
    scale = 1.0 / math.sqrt(3 * c_in)
    return {
        "w": jax.random.normal(k1, (c_out, 3 * c_in), jnp.float32) * scale,
        "w_t": jax.random.normal(k2, (emb_dim, c_out), jnp.float32)
               * (1.0 / math.sqrt(emb_dim)),
        "bias": jnp.zeros((c_out,), jnp.float32),
    }


if __name__ == "__main__":
    B, L, C = 2, 16, 8   # batch, sequence length, latent channels
    Cout = C             # TSR predicts the target latent -> same channel dim
    E = 32               # timestep embedding dim

    key = jax.random.PRNGKey(0)
    kx, km, kr, kt, kp = jax.random.split(key, 5)

    x = jax.random.normal(kx, (B, L, C), jnp.float32)
    mixture = jax.random.normal(km, (B, L, C), jnp.float32)
    reference = jax.random.normal(kr, (B, L, C), jnp.float32)
    timesteps = jax.random.uniform(kt, (B,), jnp.float32) * 1000.0
    x_len = jnp.array([L, L - 5], dtype=jnp.int32)

    params = init_params(kp, C, Cout, E)

    fwd = jax.jit(functools.partial(solospeech_tsr_forward, params))
    out, x_mask = fwd(x, timesteps, mixture, reference, x_len)
    jax.block_until_ready((out, x_mask))

    # Pure-JAX f32 reference for the implemented hot path (bf16 output -> loose tol).
    temb_ref = _timestep_embedding(timesteps, E)
    h_ref = jnp.concatenate([x, mixture, reference], axis=-1)       # (B, L, 3C)
    ref_out = (jnp.einsum("blk,ok->blo", h_ref, params["w"])
               + (temb_ref @ params["w_t"] + params["bias"])[:, None, :])
    ref_mask = jnp.arange(L)[None, :] < x_len[:, None]

    assert out.shape == (B, L, Cout) and out.dtype == jnp.bfloat16
    assert x_mask.shape == (B, L) and x_mask.dtype == jnp.bool_
    assert bool(jnp.all(x_mask == ref_mask))
    assert bool(x_mask[1, L - 6]) and not bool(x_mask[1, L - 5])
    assert bool(jnp.allclose(out.astype(jnp.float32), ref_out,
                             rtol=2e-2, atol=2e-2))

    print("KERNEL_OK")
</pallas_src>

<mosaic_0001>
module attributes {stable_mosaic.version = 11 : i64} {
  func.func @_tsr_proj_kernel(%arg0: i32, %arg1: i32, %arg2: memref<1x16x8xf32, #tpu.memory_space<vmem>>, %arg3: memref<1x16x8xf32, #tpu.memory_space<vmem>>, %arg4: memref<1x16x8xf32, #tpu.memory_space<vmem>>, %arg5: memref<8x8xf32, #tpu.memory_space<vmem>>, %arg6: memref<8x8xf32, #tpu.memory_space<vmem>>, %arg7: memref<8x8xf32, #tpu.memory_space<vmem>>, %arg8: memref<1x8x1xf32, #tpu.memory_space<vmem>>, %arg9: memref<1x8x16xbf16, #tpu.memory_space<vmem>>) attributes {dimension_semantics = [#tpu.dimension_semantics<parallel>, #tpu.dimension_semantics<parallel>], iteration_bounds = array<i64: 2, 1>, scalar_prefetch = 0 : i64, scratch_operands = 0 : i64, tpu.core_type = #tpu.core_type<tc>, window_params = [{transform_indices = @transform_0, window_bounds = array<i64: 1, 16, 8>}, {transform_indices = @transform_1, window_bounds = array<i64: 1, 16, 8>}, {transform_indices = @transform_2, window_bounds = array<i64: 1, 16, 8>}, {pipeline_mode = #tpu.pipeline_mode<synchronous>, transform_indices = @transform_3, window_bounds = array<i64: 8, 8>}, {pipeline_mode = #tpu.pipeline_mode<synchronous>, transform_indices = @transform_4, window_bounds = array<i64: 8, 8>}, {pipeline_mode = #tpu.pipeline_mode<synchronous>, transform_indices = @transform_5, window_bounds = array<i64: 8, 8>}, {transform_indices = @transform_6, window_bounds = array<i64: 1, 8, 1>}, {transform_indices = @transform_7, window_bounds = array<i64: 1, 8, 16>}]} {
    %c0 = arith.constant 0 : index
    %c0_0 = arith.constant 0 : index
    %0 = vector.load %arg5[%c0, %c0_0] : memref<8x8xf32, #tpu.memory_space<vmem>>, vector<8x8xf32>
    %c0_1 = arith.constant 0 : index
    %c0_2 = arith.constant 0 : index
    %c0_3 = arith.constant 0 : index
    %1 = vector.load %arg2[%c0_1, %c0_2, %c0_3] : memref<1x16x8xf32, #tpu.memory_space<vmem>>, vector<1x16x8xf32>
    %2 = vector.shape_cast %1 : vector<1x16x8xf32> to vector<16x8xf32>
    %cst = arith.constant dense<0.000000e+00> : vector<8x16xf32>
    %3 = tpu.matmul %0, %2, %cst {dimension_numbers = #tpu.dot_dimension_numbers<[1], [1], [0], [0], [0, 0, 1, 0], [], []>} : vector<8x8xf32>, vector<16x8xf32>, vector<8x16xf32> -> vector<8x16xf32>
    %c0_4 = arith.constant 0 : index
    %c0_5 = arith.constant 0 : index
    %4 = vector.load %arg6[%c0_4, %c0_5] : memref<8x8xf32, #tpu.memory_space<vmem>>, vector<8x8xf32>
    %c0_6 = arith.constant 0 : index
    %c0_7 = arith.constant 0 : index
    %c0_8 = arith.constant 0 : index
    %5 = vector.load %arg3[%c0_6, %c0_7, %c0_8] : memref<1x16x8xf32, #tpu.memory_space<vmem>>, vector<1x16x8xf32>
    %6 = vector.shape_cast %5 : vector<1x16x8xf32> to vector<16x8xf32>
    %cst_9 = arith.constant dense<0.000000e+00> : vector<8x16xf32>
    %7 = tpu.matmul %4, %6, %cst_9 {dimension_numbers = #tpu.dot_dimension_numbers<[1], [1], [0], [0], [0, 0, 1, 0], [], []>} : vector<8x8xf32>, vector<16x8xf32>, vector<8x16xf32> -> vector<8x16xf32>
    %8 = arith.addf %3, %7 : vector<8x16xf32>
    %c0_10 = arith.constant 0 : index
    %c0_11 = arith.constant 0 : index
    %9 = vector.load %arg7[%c0_10, %c0_11] : memref<8x8xf32, #tpu.memory_space<vmem>>, vector<8x8xf32>
    %c0_12 = arith.constant 0 : index
    %c0_13 = arith.constant 0 : index
    %c0_14 = arith.constant 0 : index
    %10 = vector.load %arg4[%c0_12, %c0_13, %c0_14] : memref<1x16x8xf32, #tpu.memory_space<vmem>>, vector<1x16x8xf32>
    %11 = vector.shape_cast %10 : vector<1x16x8xf32> to vector<16x8xf32>
    %cst_15 = arith.constant dense<0.000000e+00> : vector<8x16xf32>
    %12 = tpu.matmul %9, %11, %cst_15 {dimension_numbers = #tpu.dot_dimension_numbers<[1], [1], [0], [0], [0, 0, 1, 0], [], []>} : vector<8x8xf32>, vector<16x8xf32>, vector<8x16xf32> -> vector<8x16xf32>
    %13 = arith.addf %8, %12 : vector<8x16xf32>
    %c0_16 = arith.constant 0 : index
    %c0_17 = arith.constant 0 : index
    %c0_18 = arith.constant 0 : index
    %14 = vector.load %arg8[%c0_16, %c0_17, %c0_18] : memref<1x8x1xf32, #tpu.memory_space<vmem>>, vector<1x8x1xf32>
    %15 = vector.shape_cast %14 : vector<1x8x1xf32> to vector<8x1xf32>
    %16 = vector.broadcast %15 : vector<8x1xf32> to vector<8x16xf32>
    %17 = arith.addf %13, %16 : vector<8x16xf32>
    %18 = arith.truncf %17 : vector<8x16xf32> to vector<8x16xbf16>
    %c0_19 = arith.constant 0 : index
    %c0_20 = arith.constant 0 : index
    %c0_21 = arith.constant 0 : index
    %19 = vector.load %arg9[%c0_19, %c0_20, %c0_21] : memref<1x8x16xbf16, #tpu.memory_space<vmem>>, vector<1x8x16xbf16>
    %20 = vector.shape_cast %19 : vector<1x8x16xbf16> to vector<8x16xbf16>
    %21 = vector.shape_cast %18 : vector<8x16xbf16> to vector<1x8x16xbf16>
    tpu.vector_store %arg9[%c0_19, %c0_20, %c0_21], %21 {strides = array<i32>} : memref<1x8x16xbf16, #tpu.memory_space<vmem>>, vector<1x8x16xbf16>,
    return
  }
  func.func @transform_0(%arg0: i32, %arg1: i32) -> (i32, i32, i32) {
    %c0_i32 = arith.constant 0 : i32
    %c0_i32_0 = arith.constant 0 : i32
    return %arg0, %arg1, %c0_i32 : i32, i32, i32
  }
  func.func @transform_1(%arg0: i32, %arg1: i32) -> (i32, i32, i32) {
    %c0_i32 = arith.constant 0 : i32
    %c0_i32_0 = arith.constant 0 : i32
    return %arg0, %arg1, %c0_i32 : i32, i32, i32
  }
  func.func @transform_2(%arg0: i32, %arg1: i32) -> (i32, i32, i32) {
    %c0_i32 = arith.constant 0 : i32
    %c0_i32_0 = arith.constant 0 : i32
    return %arg0, %arg1, %c0_i32 : i32, i32, i32
  }
  func.func @transform_3(%arg0: i32, %arg1: i32) -> (i32, i32) {
    %c0_i32 = arith.constant 0 : i32
    %c0_i32_0 = arith.constant 0 : i32
    %c0_i32_1 = arith.constant 0 : i32
    return %c0_i32, %c0_i32_0 : i32, i32
  }
  func.func @transform_4(%arg0: i32, %arg1: i32) -> (i32, i32) {
    %c0_i32 = arith.constant 0 : i32
    %c0_i32_0 = arith.constant 0 : i32
    %c0_i32_1 = arith.constant 0 : i32
    return %c0_i32, %c0_i32_0 : i32, i32
  }
  func.func @transform_5(%arg0: i32, %arg1: i32) -> (i32, i32) {
    %c0_i32 = arith.constant 0 : i32
    %c0_i32_0 = arith.constant 0 : i32
    %c0_i32_1 = arith.constant 0 : i32
    return %c0_i32, %c0_i32_0 : i32, i32
  }
  func.func @transform_6(%arg0: i32, %arg1: i32) -> (i32, i32, i32) {
    %c0_i32 = arith.constant 0 : i32
    %c0_i32_0 = arith.constant 0 : i32
    %c0_i32_1 = arith.constant 0 : i32
    return %arg0, %c0_i32, %c0_i32_0 : i32, i32, i32
  }
  func.func @transform_7(%arg0: i32, %arg1: i32) -> (i32, i32, i32) {
    %c0_i32 = arith.constant 0 : i32
    %c0_i32_0 = arith.constant 0 : i32
    return %arg0, %c0_i32, %arg1 : i32, i32, i32
  }
}

</mosaic_0001>

<bundles_post_ra>
// kernel: solospeech_tsr_forward.1
= control target key start
LH: loop header
LB: loop body
LE: loop exit
PB: predicated region body
PF: predicated region fallthrough
CT: control target
= control target key end

     0   :  { %12 = vsyncpa [#allocation3], 0  ;;  %s1160_s0 = inlined_call_operand.vmem [shape: f32[2,16,8], index: 0, kind: input, shape index: {}]   ;;  %s1161_s1 = inlined_call_operand.vmem [shape: f32[2,16,8], index: 1, kind: input, shape index: {}]   ;;  %s1162_s2 = inlined_call_operand.vmem [shape: f32[2,16,8], index: 2, kind: input, shape index: {}]   ;;  %s1163_s3 = inlined_call_operand.vmem [shape: f32[8,8], index: 3, kind: input, shape index: {}]   ;;  %s1164_s4 = inlined_call_operand.vmem [shape: f32[8,8], index: 4, kind: input, shape index: {}]   ;;  %s1165_s5 = inlined_call_operand.vmem [shape: f32[8,8], index: 5, kind: input, shape index: {}]   ;;  %s1166_s6 = inlined_call_operand.vmem [shape: f32[2,8,1], index: 6, kind: input, shape index: {}]   ;;  %s1167_s7 = inlined_call_operand.hbm [shape: bf16[2,8,16], index: 7, kind: output, shape index: {}]  }
   0x1   :  { %14 = vsyncpa [#allocation3 + $0x1], 0  ;;  %s1031_s24 = smov 0   ;;  %s1033_s25 = smov 0  }
   0x2   :  { %s1035_s26 = smov 0   ;;  %s1037_s27 = smov 0  }
   0x3   :  { %s1039_s28 = smov 0   ;;  %s1041_s29 = smov 0  }
   0x4 LB: > { %s791_s30 = sadd.s32 4294967295, %s985_s29   ;;  %s792_s8 = sadd.s32 4294967294, %s985_s29   ;;  %s985_s29 = sphi %s1041_s29, %s20_s29   ;;  %s981_s28 = sphi %s1039_s28, %s1174_s28   ;;  %s977_s27 = sphi %s1037_s27, %s1173_s27   ;;  %s973_s26 = sphi %s1035_s26, %s1172_s26   ;;  %s969_s25 = sphi %s1033_s25, %s1171_s25   ;;  %s965_s24 = sphi %s1031_s24, %s1170_s24  }
   0x5   : > { %s32_s9 = sadd.s32 1, %s981_s28  ;;  %s214_s10 = sadd.s32 1, %s973_s26 }
   0x6   : > { %p34_p0 = scmp.ge.s32.totalorder %s32_s9, 2  ;;  %p224_p1 = scmp.ne.s32.totalorder %s973_s26, %s969_s25 }
   0x7   : > { %p225_p2 = scmp.eq.s32.totalorder %s791_s30, 1  ;;  %p230_p3 = scmp.ne.s32.totalorder %s969_s25, %s965_s24 }
   0x8   : > { %s1176_s9 = smov (%p34_p0, %s32_s9), 0  ;;  %p231_p5 = scmp.eq.s32.totalorder %s792_s8, 1 }
   0x9   : > { %p1071_p4 = por %p225_p2, %p224_p1  ;;  %s209_s12 = ssub.s32 %s981_s28, %s1176_s9 }
   0xa   : > { %p795_p6 = scmp.ge.s32.totalorder %s985_s29, 1  ;;  %p212_p7 = scmp.eq.s32.totalorder %s209_s12, 0 }
   0xb   : > { %p1078_p8 = por %p231_p5, %p230_p3  ;;  %p304_p9 = scmp.lt.s32.totalorder %s985_s29, 3 }
   0xc   : > { %s1084_s14 = scalar_select %p212_p7, %s973_s26, %s214_s10  }
   0xd   : > { %p305_p10 = pnand %p795_p6, %p304_p9 }
   0xe   : > { %p363_p11 = scmp.lt.s32.totalorder (!%p305_p10), %s977_s27, 1  ;;  %s814_s8 = sshll.u32 (!%p305_p10), %s977_s27, 6 }
   0xf   : > { %308 = sbr.rel (%p305_p10) target bundleno = 252 (0xfc), region = 48  ;;  %s667_s19 = scalar_lea.hbm (!%p305_p10), %s1167_s7, %s814_s8 }
  0x10   : > { %s990_s22 = smov (!%p305_p10), [#allocation2]  }
  0x14   : > { %v987_v0 = vmov 0.0   ;;  %s364_s15 = scalar_select %p363_p11, %s977_s27, 1  ;;  %vm988_vm0 = vmmov 0   ;;  %v989_v1 = vmov 0   ;;  %vm402_vm1 = vcmask 64512   ;;  %v399_v7 = vld [vmem:[%s1164_s4] sm:$0xff] }
  0x15   : > { %829 = vmatprep.subr.mxu0 %v987_v0  ;;  %836 = vmatprep.subr.mxu1 %v987_v0  ;;  %v396_v8 = vld [vmem:[%s1163_s3] sm:$0xff]  ;;  %vm652_vm2 = vcmask 125952  }
  0x16   : > { %833 = vmatprep.mubr.msk.f32.mxu0 %vm988_vm0, %v987_v0  ;;  %840 = vmatprep.mubr.msk.f32.mxu1 %vm988_vm0, %v987_v0  ;;  %s817_s16 = sshll.u32 %s364_s15, 4  ;;  %s803_s17 = sshll.u32 %s364_s15, 3  ;;  %v561_v11 = vld [vmem:[%s1165_s5] sm:$0xff] }
  0x17   : > { %908 = vset.pattern.permute.xlu0 %v989_v1  ;;  %s380_s20 = scalar_lea.vmem %s1161_s1, %s817_s16  ;;  %s370_s23 = scalar_lea.vmem %s1160_s0, %s817_s16 }
  0x18   : > { %v401_v2 = vld [vmem:[%s380_s20 + $0x8] sm:$0xff]  ;;  %s395_s10 = scalar_lea.vmem %s1166_s6, %s803_s17  ;;  %v400_v4 = vld [vmem:[%s380_s20] sm:$0xff]  ;;  %s390_s18 = scalar_lea.vmem %s1162_s2, %s817_s16 }
  0x19   : > { %v398_v3 = vld [vmem:[%s370_s23 + $0x8] sm:$0xff]  ;;  %830 = vmatpush3.xpose.msk.msra.mxu0 %vm402_vm1, %v401_v2  ;;  %v397_v5 = vld [vmem:[%s370_s23] sm:$0xff]  ;;  %s359_s23 = sand.u32 1, %s969_s25   ;;  %s913_s16 = sshll.u32 %s990_s22, 4  ;;  %s914_s16 = int_to_ptr.vmem [resolvable:$false] %s913_s16 }
  0x1a   : > { %837 = vmatpush3.xpose.msk.msra.mxu1 %vm402_vm1, %v398_v3  ;;  %831 = vmatprep.subr.mxu0 %v987_v0  ;;  %v644_v6 = vld [vmem:[%s395_s10] sm:$0xff]  ;;  %v563_v9 = vld [vmem:[%s390_s18 + $0x8] sm:$0xff]  ;;  %s796_s30 = sshll.u32 %s359_s23, 2  ;;  %s655_s17 = scalar_lea.sflag [#allocation3], %s359_s23 }
  0x1b   : > { %838 = vmatprep.subr.mxu1 %v987_v0  ;;  %647 = vperm.xlu0 %908, %v644_v6   ;;  %v562_v10 = vld [vmem:[%s390_s18] sm:$0xff]  ;;  %s361_s10 = scalar_lea.vmem [#allocation2], %s796_s30  ;;  %s915_s27 = scalar_lea.vmem %s914_s16, 128 }
  0x1c   : > { %s669_s12 = sshll.u32 %s361_s10, 4  ;;  %s670_s12 = int_to_ptr.vmem [resolvable:$true] %s669_s12 }
  0x1d   : > { %832 = vmatpush3.xpose.msk.msra.mxu0 %vm402_vm1, %v400_v4  ;;  %s909_s21 = scalar_lea.vmem %s670_s12, 64  ;;  %p916_p1 = scmp.lt.s32.totalorder %s670_s12, %s914_s16 }
  0x1e   : > { %839 = vmatpush3.xpose.msk.msra.mxu1 %vm402_vm1, %v397_v5  ;;  %843 = vmatprep.subr.mxu0 %v987_v0  ;;  %p910_p12 = scmp.ne.s32.totalorder %s670_s12, %s909_s21  ;;  %p917_p2 = scmp.lt.s32.totalorder %s915_s27, %s909_s21 }
  0x20   : > { %834 = vmatmul.mubr.msk.f32.vlgmr.msra.gmra.mxu0 %vm402_vm1, %v399_v7  ;;  %p911_p13 = pnand %p910_p12, %p1071_p4  ;;  %p918_p3 = por %p917_p2, %p916_p1 }
  0x21   : > { %841 = vmatmul.mubr.msk.f32.vlgmr.msra.gmra.mxu1 %vm402_vm1, %v396_v8  ;;  %844 = vmatpush3.xpose.msk.msra.mxu0 %vm402_vm1, %v563_v9 }
  0x22   : > { %847 = vmatprep.mubr.msk.f32.mxu0 %vm988_vm0, %v987_v0  ;;  %845 = vmatprep.subr.mxu0 %v987_v0  ;;  %p912_p0 = pneg %p911_p13 }
  0x24   : > { %p919_p5 = pnand %p918_p3, %p912_p0 }
  0x25   : > { %846 = vmatpush3.xpose.msk.msra.mxu0 %vm402_vm1, %v562_v10 }
  0x28   : > { %848 = vmatmul.mubr.msk.f32.vlgmr.msra.gmra.mxu0 %vm402_vm1, %v561_v11 }
  0x96   : > { %v648_v18 = vpop.permute.xlu0 %647 }
  0xe0   : > { %v478_v12 = vpop.f32.mrf.mxu0 }
  0xe1   : > { %v557_v13 = vpop.f32.mrf.mxu1 }
  0xe2   : > { %v835_v14 = vpop.f32.mrf.mxu0  ;;  %v558_v16 = vadd.f32 %v557_v13, %v478_v12 }
  0xe3   : > { %v842_v15 = vpop.f32.mrf.mxu1 }
  0xe8   : > { %v639_v17 = vpop.f32.mrf.mxu0 }
  0xe9   : > { %v643_v19 = vadd.f32 %v639_v17, %v558_v16 }
  0xea   : > { %v849_v20 = vpop.f32.mrf.mxu0 }
  0xeb   : > { %v650_v21 = vadd.f32 %v648_v18, %v643_v19 }
  0xed   : > { %v651_v22 = vpack.c.bf16 %v650_v21, %v650_v21 }
  0xef   : > { %653 = vst.msk [vmem:[%s361_s10] sm:$0xf] %vm652_vm2, %v651_v22 }
  0xf0   : > { %922 = shalt.err (!%p919_p5)
}
  0xf1   : > { %s923_s20 = scalar_lea.hbm %s667_s19, 64  ;;  %s927_s8 = scalar_lea.hbm %s1167_s7, 128 }
  0xf2   : > { %p924_p6 = scmp.ne.s32.totalorder %s667_s19, %s923_s20  ;;  %p928_p10 = scmp.lt.s32.totalorder %s667_s19, %s1167_s7 }
  0xf3   : > { %p929_p11 = scmp.lt.s32.totalorder %s927_s8, %s923_s20 }
  0xf4   : > { %p925_p7 = pnand %p924_p6, %p1071_p4 }
  0xf5   : > { %p930_p12 = por %p929_p11, %p928_p10 }
  0xf6   : > { %p926_p9 = pneg %p925_p7 }
  0xf8   : > { %p931_p13 = pnand %p930_p12, %p926_p9 }
  0xfa   : > { %934 = shalt.err (!%p931_p13)
}
  0xfb   : > { %850 = dma.vmem_to_hbm [thread:$0]  (%p1071_p4), %s670_s12, 64, %s667_s19, %s655_s17  }
  0xfc PF: > { %p856_p0 = scmp.ge.s32.totalorder %s985_s29, 2  ;;  %s681_s18 = sand.u32 1, %s965_s24  }
  0xfd   : > { %s682_s21 = scalar_lea.sflag [#allocation3], %s681_s18 }
  0xfe   : > { %p853_p1 = pnand %p856_p0, %p1078_p8 }
 0x100   : > { %p854_p2 = pneg %p853_p1 }
 0x102   : > { %960 = dma.done.wait (%p854_p2), %s682_s21, 64  }
 0x103   : > { %962 = vsyncadd (%p854_p2), %s682_s21, 4294967232  ;;  %s20_s29 = sadd.s32 1, %s985_s29   ;;  %s1170_s24 = smov %s969_s25 }
 0x104   : > { %p17_p3 = scmp.ge.s32.totalorder %s20_s29, 4   ;;  %s1171_s25 = smov %s973_s26 }
 0x105   : > { %s1172_s26 = smov %s1084_s14  ;;  %s1173_s27 = smov %s981_s28 }
 0x106   : > { %s1174_s28 = smov %s1176_s9  ;;  %19 = sbr.rel (!%p17_p3) target bundleno = 4 (0x4), region = 92 }
 0x10b   :  { %687 = vsyncpa [#allocation3], 1 }
 0x10c   :  { %689 = vsyncpa [#allocation3 + $0x1], 1 }

</bundles_post_ra>
